<compile_context>
chip_gen: v7x
topology: tpu7x:2x2x1
jax: 0.10.0
libtpu: 0.0.40
codegen_flags: <defaults>
</compile_context>

<pallas_src>
import jax
import jax.numpy as jnp
import numpy as np
from jax.experimental import pallas as pl
from jax.experimental.pallas import tpu as pltpu


# --------------------------- pass 0: node MLPs --------------------------------

def node_proj_kernel(h_ref, w1_ref, b1_ref, w2_ref, b2_ref, out_ref):
    """Fused left/right per-node MLPs: out = [left_mlp(h) | right_mlp(h)]."""
    f32 = jnp.float32
    h = jnp.dot(h_ref[...], w1_ref[...], preferred_element_type=f32) + b1_ref[...]
    h = jnp.maximum(h, 0.0)
    out_ref[...] = jnp.dot(h, w2_ref[...], preferred_element_type=f32) + b2_ref[...]


# --------------------------- pass A: edge force -------------------------------

def edge_force_kernel(
    h_edge_ref, x_ref, pk_ref,                                   # per-edge tiles
    wbg_ref, wng_ref, wi1_ref, bi1_ref, wi2t_ref, bi2_ref,       # fused weights
    wg1t_ref, bg1_ref, wg2t_ref, bg2_ref,
    force_ref,                                                   # [TE, 3] out
):
    f32 = jnp.float32
    h_edge = h_edge_ref[...]                        # [TE, edge_dim]
    x = x_ref[...]                                  # [TE, edge_dim]
    pk = pk_ref[...]                                # [TE, 5] = [time, dist, vec]
    t = pk[:, 0:1]
    d = pk[:, 1:2]
    vec = pk[:, 2:5]

    # fused matmuls: columns = [inter-path (inter_dim) | gate-path (gate_hidden)]
    hb = jnp.dot(h_edge, wbg_ref[...], preferred_element_type=f32)   # [TE, 64]
    hn = jnp.dot(x, wng_ref[...], preferred_element_type=f32)        # [TE, 64]

    # inter path: wi1 is zero-padded over the gate columns -> no lane slicing
    inter_h = jnp.dot(hb * hn, wi1_ref[...], preferred_element_type=f32) + bi1_ref[...]
    inter_h = jnp.maximum(inter_h, 0.0)
    inter = jnp.sum(inter_h * wi2t_ref[...], axis=-1, keepdims=True) + bi2_ref[...]

    # gate path: wg1t/bg1/wg2 zero-padded over the inter columns -> no slicing;
    # the inter columns of gate_h are junk but are multiplied by zeros below.
    gate_h = jnp.maximum(hb + hn + t * wg1t_ref[...] + bg1_ref[...], 0.0)
    gate = jnp.sum(gate_h * wg2t_ref[...], axis=-1, keepdims=True) + bg2_ref[...]

    weight_edge = inter * jax.nn.sigmoid(gate)      # [TE, 1]

    # force = w * vec / d / (d + 1) with a single reciprocal.
    # (approx=True would push it fully to the EUP; kept exact for the 1e-4 rtol.)
    inv = pl.reciprocal(d * (d + 1.0), approx=False)
    force_ref[...] = (weight_edge * inv) * vec      # [TE, 3]


# --------------------------- pass B: sparse scatter ----------------------------

def scatter_kernel(start_ref, end_ref, force_ref, idx_ref, out_ref):
    n = pl.program_id(0)
    e = pl.program_id(1)

    @pl.when(e == 0)
    def _():
        out_ref[...] = jnp.zeros_like(out_ref)

    # Edges are sorted by destination node, so all edges for this node tile
    # live in the contiguous edge-tile range [start, end] (scalar-prefetched).
    in_range = jnp.logical_and(e >= start_ref[n], e <= end_ref[n])

    @pl.when(in_range)
    def _():
        te_ = idx_ref.shape[0]
        tn_ = out_ref.shape[-1]
        local = idx_ref[...] - n * tn_                              # [TE, 1]
        lane = jax.lax.broadcasted_iota(jnp.int32, (te_, tn_), 1)   # tile-local ids
        onehot = (lane == local).astype(jnp.float32)                # [TE, TN]
        out_ref[...] += jax.lax.dot_general(
            force_ref[...], onehot,
            dimension_numbers=(((0,), (0,)), ((), ())),
            preferred_element_type=jnp.float32)                     # [3, TN]


# ------------------------------- wrapper ---------------------------------------

def _round_up(x, m):
    return ((x + m - 1) // m) * m


def pos_update(params, h_node, h_edge, edge_index, relative_vec, distance,
               edge_time, *, te=512, tn=2048, tn_node=256):
    f32 = jnp.float32
    N, node_dim = h_node.shape
    E, edge_dim = h_edge.shape
    idx_left = edge_index[0].astype(jnp.int32)
    idx_right = edge_index[1].astype(jnp.int32)
    VMEM_LIMIT = 32 * 1024 * 1024   # safe on v5e/v6e (128 MiB) and v7x (64 MiB)

    def pad_rows(a, rows, value=0):
        pad = rows - a.shape[0]
        return a if pad == 0 else jnp.pad(a, ((0, pad), (0, 0)), constant_values=value)

    # ---------------- pass 0: per-node left/right MLPs ----------------
    tn_node = _round_up(min(max(tn_node, 8), _round_up(N, 8)), 8)
    N0 = _round_up(N, tn_node)
    num_n0 = N0 // tn_node
    h_node_p = pad_rows(h_node.astype(f32), N0, 0.0)

    hidden = params["wl1"].shape[1]
    zero_h = jnp.zeros((hidden, edge_dim), f32)
    w1f = jnp.concatenate([params["wl1"], params["wr1"]], axis=1)        # [node_dim, 2H]
    b1f = jnp.concatenate([params["bl1"], params["br1"]], axis=1)        # [1, 2H]
    w2f = jnp.concatenate(                                               # block-diag
        [jnp.concatenate([params["wl2"], zero_h], axis=1),
         jnp.concatenate([zero_h, params["wr2"]], axis=1)], axis=0)      # [2H, 2*edge_dim]
    b2f = jnp.concatenate([params["bl2"], params["br2"]], axis=1)        # [1, 2*edge_dim]
    node_weights = [w.astype(f32) for w in (w1f, b1f, w2f, b2f)]

    proj = pl.pallas_call(
        node_proj_kernel,
        out_shape=jax.ShapeDtypeStruct((N0, 2 * edge_dim), f32),
        grid=(num_n0,),
        in_specs=[pl.BlockSpec((tn_node, node_dim), lambda i: (i, 0))]
                + [pl.BlockSpec(w.shape, lambda i: (0, 0)) for w in node_weights],
        out_specs=pl.BlockSpec((tn_node, 2 * edge_dim), lambda i: (i, 0)),
        compiler_params=pltpu.CompilerParams(
            dimension_semantics=("parallel",), vmem_limit_bytes=VMEM_LIMIT),
    )(h_node_p, *node_weights)
    left_proj = proj[:N, :edge_dim]
    right_proj = proj[:N, edge_dim:]

    # ---------------- sort edges by destination node ----------------
    perm = jnp.argsort(idx_left)
    il_s = idx_left[perm]
    ir_s = idx_right[perm]

    # edge tiling (sublane axis) and scatter node tiling (lane axis)
    te = _round_up(max(te, 8), 8)
    E_pad = _round_up(E, te)
    num_e = E_pad // te
    LANE = 128
    tn = _round_up(min(max(tn, LANE), _round_up(N, LANE)), LANE)
    N_pad = _round_up(N, tn)
    num_n = N_pad // tn

    # wrapper glue: gather the (already projected) node features per edge
    x = jnp.take(left_proj, il_s, axis=0) * jnp.take(right_proj, ir_s, axis=0)

    h_edge_s = pad_rows(h_edge.astype(f32)[perm], E_pad, 0.0)
    x_s = pad_rows(x.astype(f32), E_pad, 0.0)
    # packed per-edge scalars [time, dist, vec]; padded rows: dist=1 (finite
    # reciprocal), vec=0 (zero force) -> first padding guard.
    time_p = pad_rows(edge_time.reshape(E, 1).astype(f32)[perm], E_pad, 0.0)
    dist_p = pad_rows(distance.reshape(E, 1).astype(f32)[perm], E_pad, 1.0)
    vec_p = pad_rows(relative_vec.astype(f32)[perm], E_pad, 0.0)
    packed = jnp.concatenate([time_p, dist_p, vec_p], axis=1)            # [E_pad, 5]
    # sentinel index N_pad matches no lane in any node tile -> second guard.
    idx_s = pad_rows(il_s.reshape(E, 1), E_pad, N_pad).astype(jnp.int32)

    # ---------------- fused / zero-padded BondFFN weights ----------------
    inter_dim = params["wi1"].shape[0]
    gate_hidden = params["wg1b"].shape[1]
    wbg = jnp.concatenate([params["wb"], params["wg1b"]], axis=1)        # [edge, I+G]
    wng = jnp.concatenate([params["wn"], params["wg1n"]], axis=1)        # [edge, I+G]
    wi1_pad = jnp.concatenate(
        [params["wi1"], jnp.zeros((gate_hidden, inter_dim), f32)], axis=0)   # [I+G, I]
    wi2_t = params["wi2"].T                                              # [1, I]
    wg1t_pad = jnp.concatenate(
        [jnp.zeros((1, inter_dim), f32), params["wg1t"]], axis=1)        # [1, I+G]
    bg1_pad = jnp.concatenate(
        [jnp.zeros((1, inter_dim), f32), params["bg1"]], axis=1)         # [1, I+G]
    wg2_t_pad = jnp.concatenate(
        [jnp.zeros((1, inter_dim), f32), params["wg2"].T], axis=1)       # [1, I+G]

    edge_inputs = [h_edge_s, x_s, packed]
    edge_weights = [w.astype(f32) for w in (
        wbg, wng, wi1_pad, params["bi1"], wi2_t, params["bi2"],
        wg1t_pad, bg1_pad, wg2_t_pad, params["bg2"])]

    # ---------------- pass A: force per edge (grid over edges only) --------------
    force = pl.pallas_call(
        edge_force_kernel,
        out_shape=jax.ShapeDtypeStruct((E_pad, 3), f32),
        grid=(num_e,),
        in_specs=[pl.BlockSpec((te, a.shape[1]), lambda e: (e, 0)) for a in edge_inputs]
                + [pl.BlockSpec(w.shape, lambda e: (0, 0)) for w in edge_weights],
        out_specs=pl.BlockSpec((te, 3), lambda e: (e, 0)),
        compiler_params=pltpu.CompilerParams(
            dimension_semantics=("parallel",), vmem_limit_bytes=VMEM_LIMIT),
    )(*edge_inputs, *edge_weights)

    # ---------------- pass B: sparse scatter over sorted edges -------------------
    # per-node-tile edge-tile ranges from the sorted destination indices
    bounds = (jnp.arange(num_n + 1, dtype=jnp.int32) * tn).astype(il_s.dtype)
    pos = jnp.searchsorted(il_s, bounds)                        # [num_n+1] in [0, E]
    lo, hi = pos[:-1], pos[1:]
    has = hi > lo
    start_tile = jnp.where(has, lo // te, num_e).astype(jnp.int32)
    end_tile = jnp.where(has, (hi - 1) // te, -1).astype(jnp.int32)

    out_pad = pl.pallas_call(
        scatter_kernel,
        out_shape=jax.ShapeDtypeStruct((3, N_pad), f32),
        grid_spec=pltpu.PrefetchScalarGridSpec(
            num_scalar_prefetch=2,
            grid=(num_n, num_e),
            in_specs=[pl.BlockSpec((te, 3), lambda n, e, st, en: (e, 0)),
                      pl.BlockSpec((te, 1), lambda n, e, st, en: (e, 0))],
            out_specs=pl.BlockSpec((3, tn), lambda n, e, st, en: (0, n)),
        ),
        compiler_params=pltpu.CompilerParams(
            dimension_semantics=("parallel", "arbitrary"),
            vmem_limit_bytes=VMEM_LIMIT),
    )(start_tile, end_tile, force, idx_s)

    # lane-dense [3, N_pad] -> [N, 3]
    return out_pad[:, :N].T


# --------------------------- reference (pure JAX) -------------------------------

def pos_update_ref(params, h_node, h_edge, edge_index, relative_vec, distance, edge_time):
    il, ir = edge_index[0], edge_index[1]

    def mlp(x, w1, b1, w2, b2):
        return jnp.maximum(x @ w1 + b1, 0.0) @ w2 + b2

    left_feat = mlp(h_node[il], params["wl1"], params["bl1"], params["wl2"], params["bl2"])
    right_feat = mlp(h_node[ir], params["wr1"], params["br1"], params["wr2"], params["br2"])
    x = left_feat * right_feat

    bond = h_edge @ params["wb"]
    node = x @ params["wn"]
    inter = mlp(bond * node, params["wi1"], params["bi1"], params["wi2"], params["bi2"])

    wg1 = jnp.concatenate([params["wg1b"], params["wg1n"], params["wg1t"]], axis=0)
    gate_in = jnp.concatenate([h_edge, x, edge_time], axis=-1)
    gate = mlp(gate_in, wg1, params["bg1"], params["wg2"], params["bg2"])

    w = inter * jax.nn.sigmoid(gate)
    force = w * relative_vec / distance[:, None] / (distance[:, None] + 1.0)
    delta = jax.ops.segment_sum(force, il, num_segments=h_node.shape[0])
    return delta


# --------------------------------- main -----------------------------------------

if __name__ == "__main__":
    node_dim, edge_dim, hidden_dim = 32, 16, 32
    N, E = 200, 512   # small, but enough for 2 node tiles / 8 edge tiles

    key = jax.random.PRNGKey(0)
    ks = jax.random.split(key, 24)

    def w(k, shape):
        return jax.random.normal(k, shape, dtype=jnp.float32) * 0.1

    params = {
        # left_lin_edge: MLP(node_dim, edge_dim, hidden_dim)
        "wl1": w(ks[0], (node_dim, hidden_dim)), "bl1": w(ks[1], (1, hidden_dim)),
        "wl2": w(ks[2], (hidden_dim, edge_dim)), "bl2": w(ks[3], (1, edge_dim)),
        # right_lin_edge
        "wr1": w(ks[4], (node_dim, hidden_dim)), "br1": w(ks[5], (1, hidden_dim)),
        "wr2": w(ks[6], (hidden_dim, edge_dim)), "br2": w(ks[7], (1, edge_dim)),
        # BondFFN(bond_dim=edge_dim, node_dim=edge_dim, inter_dim=node_dim, out_dim=1)
        "wb": w(ks[8], (edge_dim, node_dim)),    # bond_linear (no bias)
        "wn": w(ks[9], (edge_dim, node_dim)),    # node_linear (no bias)
        # inter_module: MLP(inter_dim, 1, inter_dim)
        "wi1": w(ks[10], (node_dim, node_dim)), "bi1": w(ks[11], (1, node_dim)),
        "wi2": w(ks[12], (node_dim, 1)),        "bi2": w(ks[13], (1, 1)),
        # gate: MLP(2*edge_dim + 1, 1, 32) — W1 split into [bond | node | time] rows
        "wg1b": w(ks[14], (edge_dim, 32)),
        "wg1n": w(ks[15], (edge_dim, 32)),
        "wg1t": w(ks[16], (1, 32)),
        "bg1": w(ks[17], (1, 32)),
        "wg2": w(ks[18], (32, 1)), "bg2": w(ks[19], (1, 1)),
    }

    h_node = jax.random.normal(ks[20], (N, node_dim), dtype=jnp.float32)
    h_edge = jax.random.normal(ks[21], (E, edge_dim), dtype=jnp.float32)
    edge_index = jax.random.randint(ks[22], (2, E), 0, N, dtype=jnp.int32)
    relative_vec = jax.random.normal(ks[23], (E, 3), dtype=jnp.float32)
    distance = jnp.linalg.norm(relative_vec, axis=-1) + 0.5       # [E], positive
    edge_time = jnp.linspace(0.0, 1.0, E, dtype=jnp.float32).reshape(E, 1)

    # te=64 / tn=128 -> 8 edge tiles and 2 node tiles: exercises the sorted,
    # range-gated scatter, the resident accumulator, and multi-tile node MLPs.
    out = pos_update(params, h_node, h_edge, edge_index, relative_vec, distance,
                     edge_time, te=64, tn=128, tn_node=128)
    out = jax.block_until_ready(out)

    ref = pos_update_ref(params, h_node, h_edge, edge_index, relative_vec, distance, edge_time)
    np.testing.assert_allclose(np.asarray(out), np.asarray(ref), rtol=1e-4, atol=1e-5)

    print("KERNEL_OK")
</pallas_src>

<mosaic_0001>
module attributes {stable_mosaic.version = 11 : i64} {
  func.func @node_proj_kernel(%arg0: i32, %arg1: memref<128x32xf32, #tpu.memory_space<vmem>>, %arg2: memref<32x64xf32, #tpu.memory_space<vmem>>, %arg3: memref<1x64xf32, #tpu.memory_space<vmem>>, %arg4: memref<64x32xf32, #tpu.memory_space<vmem>>, %arg5: memref<1x32xf32, #tpu.memory_space<vmem>>, %arg6: memref<128x32xf32, #tpu.memory_space<vmem>>) attributes {dimension_semantics = [#tpu.dimension_semantics<parallel>], iteration_bounds = array<i64: 2>, scalar_prefetch = 0 : i64, scratch_operands = 0 : i64, tpu.core_type = #tpu.core_type<tc>, window_params = [{transform_indices = @transform_0, window_bounds = array<i64: 128, 32>}, {pipeline_mode = #tpu.pipeline_mode<synchronous>, transform_indices = @transform_1, window_bounds = array<i64: 32, 64>}, {pipeline_mode = #tpu.pipeline_mode<synchronous>, transform_indices = @transform_2, window_bounds = array<i64: 1, 64>}, {pipeline_mode = #tpu.pipeline_mode<synchronous>, transform_indices = @transform_3, window_bounds = array<i64: 64, 32>}, {pipeline_mode = #tpu.pipeline_mode<synchronous>, transform_indices = @transform_4, window_bounds = array<i64: 1, 32>}, {transform_indices = @transform_5, window_bounds = array<i64: 128, 32>}]} {
    %c0 = arith.constant 0 : index
    %c0_0 = arith.constant 0 : index
    %0 = vector.load %arg1[%c0, %c0_0] : memref<128x32xf32, #tpu.memory_space<vmem>>, vector<128x32xf32>
    %c0_1 = arith.constant 0 : index
    %c0_2 = arith.constant 0 : index
    %1 = vector.load %arg2[%c0_1, %c0_2] : memref<32x64xf32, #tpu.memory_space<vmem>>, vector<32x64xf32>
    %cst = arith.constant dense<0.000000e+00> : vector<128x64xf32>
    %2 = tpu.matmul %0, %1, %cst {dimension_numbers = #tpu.dot_dimension_numbers<[1], [0], [0], [1], [0, 0, 1, 1], [], []>} : vector<128x32xf32>, vector<32x64xf32>, vector<128x64xf32> -> vector<128x64xf32>
    %c0_3 = arith.constant 0 : index
    %c0_4 = arith.constant 0 : index
    %3 = vector.load %arg3[%c0_3, %c0_4] : memref<1x64xf32, #tpu.memory_space<vmem>>, vector<1x64xf32>
    %4 = vector.broadcast %3 : vector<1x64xf32> to vector<128x64xf32>
    %5 = arith.addf %2, %4 : vector<128x64xf32>
    %cst_5 = arith.constant 0.000000e+00 : f32
    %6 = vector.broadcast %cst_5 : f32 to vector<128x64xf32>
    %7 = arith.maximumf %5, %6 : vector<128x64xf32>
    %c0_6 = arith.constant 0 : index
    %c0_7 = arith.constant 0 : index
    %8 = vector.load %arg4[%c0_6, %c0_7] : memref<64x32xf32, #tpu.memory_space<vmem>>, vector<64x32xf32>
    %cst_8 = arith.constant dense<0.000000e+00> : vector<128x32xf32>
    %9 = tpu.matmul %7, %8, %cst_8 {dimension_numbers = #tpu.dot_dimension_numbers<[1], [0], [0], [1], [0, 0, 1, 1], [], []>} : vector<128x64xf32>, vector<64x32xf32>, vector<128x32xf32> -> vector<128x32xf32>
    %c0_9 = arith.constant 0 : index
    %c0_10 = arith.constant 0 : index
    %10 = vector.load %arg5[%c0_9, %c0_10] : memref<1x32xf32, #tpu.memory_space<vmem>>, vector<1x32xf32>
    %11 = vector.broadcast %10 : vector<1x32xf32> to vector<128x32xf32>
    %12 = arith.addf %9, %11 : vector<128x32xf32>
    %c0_11 = arith.constant 0 : index
    %c0_12 = arith.constant 0 : index
    %13 = vector.load %arg6[%c0_11, %c0_12] : memref<128x32xf32, #tpu.memory_space<vmem>>, vector<128x32xf32>
    tpu.vector_store %arg6[%c0_11, %c0_12], %12 {strides = array<i32>} : memref<128x32xf32, #tpu.memory_space<vmem>>, vector<128x32xf32>,
    return
  }
  func.func @transform_0(%arg0: i32) -> (i32, i32) {
    %c0_i32 = arith.constant 0 : i32
    %c0_i32_0 = arith.constant 0 : i32
    return %arg0, %c0_i32 : i32, i32
  }
  func.func @transform_1(%arg0: i32) -> (i32, i32) {
    %c0_i32 = arith.constant 0 : i32
    %c0_i32_0 = arith.constant 0 : i32
    %c0_i32_1 = arith.constant 0 : i32
    return %c0_i32, %c0_i32_0 : i32, i32
  }
  func.func @transform_2(%arg0: i32) -> (i32, i32) {
    %c0_i32 = arith.constant 0 : i32
    %c0_i32_0 = arith.constant 0 : i32
    %c0_i32_1 = arith.constant 0 : i32
    return %c0_i32, %c0_i32_0 : i32, i32
  }
  func.func @transform_3(%arg0: i32) -> (i32, i32) {
    %c0_i32 = arith.constant 0 : i32
    %c0_i32_0 = arith.constant 0 : i32
    %c0_i32_1 = arith.constant 0 : i32
    return %c0_i32, %c0_i32_0 : i32, i32
  }
  func.func @transform_4(%arg0: i32) -> (i32, i32) {
    %c0_i32 = arith.constant 0 : i32
    %c0_i32_0 = arith.constant 0 : i32
    %c0_i32_1 = arith.constant 0 : i32
    return %c0_i32, %c0_i32_0 : i32, i32
  }
  func.func @transform_5(%arg0: i32) -> (i32, i32) {
    %c0_i32 = arith.constant 0 : i32
    %c0_i32_0 = arith.constant 0 : i32
    return %arg0, %c0_i32 : i32, i32
  }
}

</mosaic_0001>

<bundles_post_ra>
// kernel: tpu_custom_call.1
= control target key start
LH: loop header
LB: loop body
LE: loop exit
PB: predicated region body
PF: predicated region fallthrough
CT: control target
= control target key end

     0   :  { %s985_s18 = smov 0   ;;  %s1135_s0 = inlined_call_operand.vmem [shape: f32[256,32], index: 0, kind: input, shape index: {}]   ;;  %s1136_s1 = inlined_call_operand.vmem [shape: f32[32,64], index: 1, kind: input, shape index: {}]   ;;  %s1137_s2 = inlined_call_operand.vmem [shape: f32[1,64], index: 2, kind: input, shape index: {}]   ;;  %s1138_s3 = inlined_call_operand.vmem [shape: f32[64,32], index: 3, kind: input, shape index: {}]   ;;  %s1139_s4 = inlined_call_operand.vmem [shape: f32[1,32], index: 4, kind: input, shape index: {}]   ;;  %s1140_s5 = inlined_call_operand.vmem [shape: f32[256,32], index: 5, kind: output, shape index: {}]  }
   0x1 LB: > { %s746_s19 = sadd.s32 4294967295, %s953_s18   ;;  %p750_p0 = scmp.ge.s32.totalorder %s953_s18, 1  ;;  %s953_s18 = sphi %s985_s18, %s15_s18  }
   0x2   : > { %p188_p1 = scmp.lt.s32.totalorder %s953_s18, 3 }
   0x4   : > { %p189_p2 = pnand %p750_p0, %p188_p1 }
   0x5   : > { %v244_v0 = vld [vmem:[%s1136_s1] sm:$0xff] (!%p189_p2)  ;;  %v245_v1 = vld [vmem:[%s1136_s1 + $0x8] sm:$0xff] (!%p189_p2)  ;;  %v246_v2 = vld [vmem:[%s1136_s1 + $0x10] sm:$0xff] (!%p189_p2)  ;;  %s751_s26 = sshll.u32 (!%p189_p2), %s746_s19, 4  ;;  %vm255_vm0 = vcmask (!%p189_p2), 261120   ;;  %vm480_vm1 = vcmask (!%p189_p2), 523264  }
   0x6   : > { %192 = sbr.rel (%p189_p2) target bundleno = 480 (0x1e0), region = 40  ;;  %v907_v3 = vpack.c.bf16 (!%p189_p2), %v245_v1, %v244_v0  ;;  %v247_v4 = vld [vmem:[%s1136_s1 + $0x18] sm:$0xff] (!%p189_p2)  ;;  %p217_p3 = scmp.lt.s32.totalorder (!%p189_p2), %s751_s26, 31  ;;  %v465_v5 = vld [vmem:[%s1138_s3] sm:$0xff] (!%p189_p2)  ;;  %v466_v6 = vld [vmem:[%s1138_s3 + $0x8] sm:$0xff] (!%p189_p2) }
   0x7   : > { %v911_v7 = vpack.c.bf16 (!%p189_p2), %v247_v4, %v246_v2  ;;  %v915_v8 = vpack.c.bf16 (!%p189_p2), %v466_v6, %v465_v5  ;;  %v467_v9 = vld [vmem:[%s1138_s3 + $0x10] sm:$0xff] (!%p189_p2)  ;;  %v468_v10 = vld [vmem:[%s1138_s3 + $0x18] sm:$0xff] (!%p189_p2)  ;;  %v469_v12 = vld [vmem:[%s1138_s3 + $0x20] sm:$0xff] (!%p189_p2) }
   0x8   : > { %908 = vmatprep.subr.bf16.mxu0 (!%p189_p2), %v907_v3  ;;  %v919_v11 = vpack.c.bf16 (!%p189_p2), %v468_v10, %v467_v9  ;;  %v470_v13 = vld [vmem:[%s1138_s3 + $0x28] sm:$0xff] (!%p189_p2)  ;;  %v471_v31 = vld [vmem:[%s1138_s3 + $0x30] sm:$0xff] (!%p189_p2)  ;;  %v472_v32 = vld [vmem:[%s1138_s3 + $0x38] sm:$0xff] (!%p189_p2) }
   0x9   : > { %910 = vmatpush3.bf16.msra.mxu0 (!%p189_p2), %v907_v3  ;;  %931 = vmatprep.subr.bf16.mxu1 (!%p189_p2), %v915_v8  ;;  %v923_v16 = vpack.c.bf16 (!%p189_p2), %v470_v13, %v469_v12  ;;  %v927_v33 = vpack.c.bf16 (!%p189_p2), %v472_v32, %v471_v31  ;;  %v755_v34 = vld [vmem:[%s1137_s2] ss:$0 sm:$0xff] (!%p189_p2) }
   0xa   : > { %912 = vmatprep.subr.bf16.mxu0 (!%p189_p2), %v911_v7  ;;  %935 = vmatpush3.bf16.msra.mxu1 (!%p189_p2), %v915_v8 }
   0xb   : > { %932 = vmatprep.subr.bf16.mxu1 (!%p189_p2), %v919_v11 }
   0xd   : > { %s1142_s26 = smov (!%p217_p3, %s751_s26), 31  ;;  %914 = vmatpush3.bf16.msra.mxu0 %v911_v7 }
   0xe   : > { %s752_s12 = sshll.u32 %s1142_s26, 3  ;;  %916 = vmatprep.subr.bf16.mxu0 %v915_v8  ;;  %936 = vmatpush3.bf16.msra.mxu1 %v919_v11 }
   0xf   : > { %s1031_s20 = scalar_lea.vmem %s1135_s0, %s752_s12  ;;  %933 = vmatprep.subr.bf16.mxu1 %v923_v16  ;;  %s1098_s7 = scalar_lea.vmem %s1140_s5, %s752_s12 }
  0x10   : > { %v228_v14 = vld [vmem:[%s1031_s20] sm:$0xff]  ;;  %v229_v15 = vld [vmem:[%s1031_s20 + $0x8] sm:$0xff]  ;;  %v230_v17 = vld [vmem:[%s1031_s20 + $0x10] sm:$0xff] }
  0x11   : > { %843 = vmatprep.mubr.msk.f32.mxu0 %vm255_vm0, %v228_v14  ;;  %v231_v18 = vld [vmem:[%s1031_s20 + $0x18] sm:$0xff]  ;;  %v232_v19 = vld [vmem:[%s1031_s20 + $0x20] sm:$0xff]  ;;  %v233_v20 = vld [vmem:[%s1031_s20 + $0x28] sm:$0xff] }
  0x12   : > { %844 = vmatmul.mubr.msk.f32.vlgmr.msra.gmra.mrb[0].mxu0 %vm255_vm0, %v229_v15  ;;  %937 = vmatpush3.bf16.msra.mxu1 %v923_v16  ;;  %v234_v21 = vld [vmem:[%s1031_s20 + $0x30] sm:$0xff]  ;;  %v235_v22 = vld [vmem:[%s1031_s20 + $0x38] sm:$0xff]  ;;  %v236_v23 = vld [vmem:[%s1031_s20 + $0x40] sm:$0xff] }
  0x13   : > { %846 = vmatprep.mubr.msk.f32.mxu0 %vm255_vm0, %v230_v17  ;;  %918 = vmatpush3.bf16.msra.mxu0 %v915_v8  ;;  %v237_v24 = vld [vmem:[%s1031_s20 + $0x48] sm:$0xff]  ;;  %v238_v25 = vld [vmem:[%s1031_s20 + $0x50] sm:$0xff]  ;;  %v239_v26 = vld [vmem:[%s1031_s20 + $0x58] sm:$0xff] }
  0x14   : > { %920 = vmatprep.subr.bf16.mxu0 %v919_v11  ;;  %v240_v27 = vld [vmem:[%s1031_s20 + $0x60] sm:$0xff]  ;;  %v241_v28 = vld [vmem:[%s1031_s20 + $0x68] sm:$0xff]  ;;  %v242_v29 = vld [vmem:[%s1031_s20 + $0x70] sm:$0xff]  ;;  %934 = vmatprep.subr.bf16.mxu1 %v927_v33 }
  0x15   : > { %v243_v30 = vld [vmem:[%s1031_s20 + $0x78] sm:$0xff] }
  0x16   : > { %847 = vmatmul.mubr.msk.f32.gmra.mrb[2].mxu0 %vm255_vm0, %v231_v18  ;;  %938 = vmatpush3.bf16.msra.mxu1 %v927_v33 }
  0x17   : > { %849 = vmatprep.mubr.msk.f32.mxu0 %vm255_vm0, %v232_v19  ;;  %922 = vmatpush3.bf16.msra.mxu0 %v919_v11  ;;  %v772_v19 = vld [vmem:[%s1139_s4] ss:$0 sm:$0xff] }
  0x18   : > { %924 = vmatprep.subr.bf16.mxu0 %v923_v16 }
  0x1a   : > { %850 = vmatmul.mubr.msk.f32.gmra.mrb[4].mxu0 %vm255_vm0, %v233_v20 }
  0x1b   : > { %852 = vmatprep.mubr.msk.f32.mxu0 %vm255_vm0, %v234_v21  ;;  %926 = vmatpush3.bf16.msra.mxu0 %v923_v16 }
  0x1c   : > { %928 = vmatprep.subr.bf16.mxu0 %v927_v33 }
  0x1e   : > { %853 = vmatmul.mubr.msk.f32.gmra.mrb[6].mxu0 %vm255_vm0, %v235_v22 }
  0x1f   : > { %855 = vmatprep.mubr.msk.f32.mxu0 %vm255_vm0, %v236_v23  ;;  %930 = vmatpush3.bf16.msra.mxu0 %v927_v33 }
  0x22   : > { %856 = vmatmul.mubr.msk.f32.gmra.mrb[8].mxu0 %vm255_vm0, %v237_v24 }
  0x23   : > { %858 = vmatprep.mubr.msk.f32.mxu0 %vm255_vm0, %v238_v25 }
  0x26   : > { %859 = vmatmul.mubr.msk.f32.gmra.mrb[10].mxu0 %vm255_vm0, %v239_v26 }
  0x27   : > { %861 = vmatprep.mubr.msk.f32.mxu0 %vm255_vm0, %v240_v27 }
  0x2a   : > { %862 = vmatmul.mubr.msk.f32.gmra.mrb[12].mxu0 %vm255_vm0, %v241_v28 }
  0x2b   : > { %864 = vmatprep.mubr.msk.f32.mxu0 %vm255_vm0, %v242_v29 }
  0x2e   : > { %865 = vmatmul.mubr.msk.f32.gmra.mrb[14].mxu0 %vm255_vm0, %v243_v30 }
  0xe5   : > { %v845_v35 = vpop.f32.mrb[0].mxu0 }
  0xe6   : > { %v376_v36 = vadd.f32 %v845_v35, %v755_v34  ;;  %v370_v37 = vpop.f32.mrb[1].mxu0 }
  0xe7   : > { %v371_v38 = vadd.f32 %v755_v34, %v370_v37 }
  0xe8   : > { %v450_v41 = vmax.f32 %v376_v36, 0.0 }
  0xe9   : > { %v449_v39 = vmax.f32 %v371_v38, 0.0  ;;  %v848_v40 = vpop.f32.mrb[2].mxu0 }
  0xea   : > { %v386_v42 = vadd.f32 %v848_v40, %v755_v34  ;;  %v380_v43 = vpop.f32.mrb[3].mxu0 }
  0xeb   : > { %v381_v44 = vadd.f32 %v755_v34, %v380_v43  ;;  %883 = vmatprep.mubr.msk.f32.mxu0 %vm480_vm1, %v449_v39 }
  0xec   : > { %884 = vmatmul.mubr.msk.f32.vlgmr.msra.gmra.mrb[16].mxu0 %vm480_vm1, %v450_v41  ;;  %v452_v47 = vmax.f32 %v386_v42, 0.0 }
  0xed   : > { %v451_v45 = vmax.f32 %v381_v44, 0.0  ;;  %v851_v46 = vpop.f32.mrb[4].mxu0 }
  0xee   : > { %v396_v48 = vadd.f32 %v851_v46, %v755_v34  ;;  %v390_v49 = vpop.f32.mrb[5].mxu0 }
  0xef   : > { %v391_v50 = vadd.f32 %v755_v34, %v390_v49  ;;  %886 = vmatprep.mubr.msk.f32.mxu1 %vm480_vm1, %v451_v45 }
  0xf0   : > { %887 = vmatmul.mubr.msk.f32.vlgmr.msra.gmra.mrb[0].mxu1 %vm480_vm1, %v452_v47  ;;  %v454_v53 = vmax.f32 %v396_v48, 0.0 }
  0xf1   : > { %v453_v51 = vmax.f32 %v391_v50, 0.0  ;;  %v854_v52 = vpop.f32.mrb[6].mxu0 }
  0xf2   : > { %v406_v54 = vadd.f32 %v854_v52, %v755_v34  ;;  %v400_v55 = vpop.f32.mrb[7].mxu0 }
  0xf3   : > { %v401_v56 = vadd.f32 %v755_v34, %v400_v55  ;;  %889 = vmatprep.mubr.msk.f32.mxu1 %vm480_vm1, %v453_v51 }
  0xf4   : > { %890 = vmatmul.mubr.msk.f32.gmra.mrb[2].mxu1 %vm480_vm1, %v454_v53  ;;  %v456_v59 = vmax.f32 %v406_v54, 0.0 }
  0xf5   : > { %v455_v57 = vmax.f32 %v401_v56, 0.0  ;;  %v857_v58 = vpop.f32.mrb[8].mxu0 }
  0xf6   : > { %v416_v60 = vadd.f32 %v857_v58, %v755_v34  ;;  %v410_v61 = vpop.f32.mrb[9].mxu0 }
  0xf7   : > { %v411_v62 = vadd.f32 %v755_v34, %v410_v61  ;;  %892 = vmatprep.mubr.msk.f32.mxu1 %vm480_vm1, %v455_v57 }
  0xf8   : > { %893 = vmatmul.mubr.msk.f32.gmra.mrb[4].mxu1 %vm480_vm1, %v456_v59  ;;  %v458_v1 = vmax.f32 %v416_v60, 0.0 }
  0xf9   : > { %v457_v63 = vmax.f32 %v411_v62, 0.0  ;;  %v860_v0 = vpop.f32.mrb[10].mxu0 }
  0xfa   : > { %v426_v2 = vadd.f32 %v860_v0, %v755_v34  ;;  %v420_v3 = vpop.f32.mrb[11].mxu0 }
  0xfb   : > { %v421_v4 = vadd.f32 %v755_v34, %v420_v3  ;;  %895 = vmatprep.mubr.msk.f32.mxu1 %vm480_vm1, %v457_v63 }
  0xfc   : > { %896 = vmatmul.mubr.msk.f32.gmra.mrb[6].mxu1 %vm480_vm1, %v458_v1  ;;  %v460_v7 = vmax.f32 %v426_v2, 0.0 }
  0xfd   : > { %v459_v5 = vmax.f32 %v421_v4, 0.0  ;;  %v863_v6 = vpop.f32.mrb[12].mxu0 }
  0xfe   : > { %v436_v8 = vadd.f32 %v863_v6, %v755_v34  ;;  %v430_v9 = vpop.f32.mrb[13].mxu0 }
  0xff   : > { %v431_v10 = vadd.f32 %v755_v34, %v430_v9  ;;  %898 = vmatprep.mubr.msk.f32.mxu1 %vm480_vm1, %v459_v5 }
 0x100   : > { %899 = vmatmul.mubr.msk.f32.gmra.mrb[8].mxu1 %vm480_vm1, %v460_v7  ;;  %v462_v13 = vmax.f32 %v436_v8, 0.0 }
 0x101   : > { %v461_v11 = vmax.f32 %v431_v10, 0.0  ;;  %v866_v12 = vpop.f32.mrb[14].mxu0 }
 0x102   : > { %v446_v14 = vadd.f32 %v866_v12, %v755_v34  ;;  %v440_v15 = vpop.f32.mrb[15].mxu0 }
 0x103   : > { %v441_v16 = vadd.f32 %v755_v34, %v440_v15  ;;  %901 = vmatprep.mubr.msk.f32.mxu1 %vm480_vm1, %v461_v11 }
 0x104   : > { %902 = vmatmul.mubr.msk.f32.gmra.mrb[10].mxu1 %vm480_vm1, %v462_v13  ;;  %v464_v18 = vmax.f32 %v446_v14, 0.0 }
 0x105   : > { %v463_v17 = vmax.f32 %v441_v16, 0.0 }
 0x107   : > { %904 = vmatprep.mubr.msk.f32.mxu1 %vm480_vm1, %v463_v17 }
 0x108   : > { %905 = vmatmul.mubr.msk.f32.gmra.mrb[12].mxu1 %vm480_vm1, %v464_v18 }
 0x1bf   : > { %v885_v20 = vpop.f32.mrb[16].mxu0 }
 0x1c0   : > { %v601_v21 = vadd.f32 %v885_v20, %v772_v19  ;;  %v595_v22 = vpop.f32.mrb[17].mxu0 }
 0x1c1   : > { %v596_v23 = vadd.f32 %v772_v19, %v595_v22 }
 0x1c2   : > { %675 = vst.msk [vmem:[%s1098_s7 + $0x8] sm:$0xff] %vm255_vm0, %v601_v21 }
 0x1c3   : > { %674 = vst.msk [vmem:[%s1098_s7] sm:$0xff] %vm255_vm0, %v596_v23  ;;  %v888_v24 = vpop.f32.mrb[0].mxu1 }
 0x1c4   : > { %v611_v25 = vadd.f32 %v888_v24, %v772_v19  ;;  %v605_v26 = vpop.f32.mrb[1].mxu1 }
 0x1c5   : > { %v606_v27 = vadd.f32 %v772_v19, %v605_v26 }
 0x1c6   : > { %677 = vst.msk [vmem:[%s1098_s7 + $0x18] sm:$0xff] %vm255_vm0, %v611_v25 }
 0x1c7   : > { %676 = vst.msk [vmem:[%s1098_s7 + $0x10] sm:$0xff] %vm255_vm0, %v606_v27  ;;  %v891_v28 = vpop.f32.mrb[2].mxu1 }
 0x1c8   : > { %v621_v29 = vadd.f32 %v891_v28, %v772_v19  ;;  %v615_v30 = vpop.f32.mrb[3].mxu1 }
 0x1c9   : > { %v616_v31 = vadd.f32 %v772_v19, %v615_v30 }
 0x1ca   : > { %679 = vst.msk [vmem:[%s1098_s7 + $0x28] sm:$0xff] %vm255_vm0, %v621_v29 }
 0x1cb   : > { %678 = vst.msk [vmem:[%s1098_s7 + $0x20] sm:$0xff] %vm255_vm0, %v616_v31  ;;  %v894_v32 = vpop.f32.mrb[4].mxu1 }
 0x1cc   : > { %v631_v33 = vadd.f32 %v894_v32, %v772_v19  ;;  %v625_v34 = vpop.f32.mrb[5].mxu1 }
 0x1cd   : > { %v626_v35 = vadd.f32 %v772_v19, %v625_v34 }
 0x1ce   : > { %681 = vst.msk [vmem:[%s1098_s7 + $0x38] sm:$0xff] %vm255_vm0, %v631_v33 }
 0x1cf   : > { %680 = vst.msk [vmem:[%s1098_s7 + $0x30] sm:$0xff] %vm255_vm0, %v626_v35  ;;  %v897_v36 = vpop.f32.mrb[6].mxu1 }
 0x1d0   : > { %v641_v37 = vadd.f32 %v897_v36, %v772_v19  ;;  %v635_v38 = vpop.f32.mrb[7].mxu1 }
 0x1d1   : > { %v636_v39 = vadd.f32 %v772_v19, %v635_v38 }
 0x1d2   : > { %683 = vst.msk [vmem:[%s1098_s7 + $0x48] sm:$0xff] %vm255_vm0, %v641_v37 }
 0x1d3   : > { %682 = vst.msk [vmem:[%s1098_s7 + $0x40] sm:$0xff] %vm255_vm0, %v636_v39  ;;  %v900_v40 = vpop.f32.mrb[8].mxu1 }
 0x1d4   : > { %v651_v41 = vadd.f32 %v900_v40, %v772_v19  ;;  %v645_v42 = vpop.f32.mrb[9].mxu1 }
 0x1d5   : > { %v646_v43 = vadd.f32 %v772_v19, %v645_v42 }
 0x1d6   : > { %685 = vst.msk [vmem:[%s1098_s7 + $0x58] sm:$0xff] %vm255_vm0, %v651_v41 }
 0x1d7   : > { %684 = vst.msk [vmem:[%s1098_s7 + $0x50] sm:$0xff] %vm255_vm0, %v646_v43  ;;  %v903_v44 = vpop.f32.mrb[10].mxu1 }
 0x1d8   : > { %v661_v45 = vadd.f32 %v903_v44, %v772_v19  ;;  %v655_v46 = vpop.f32.mrb[11].mxu1 }
 0x1d9   : > { %v656_v47 = vadd.f32 %v772_v19, %v655_v46 }
 0x1da   : > { %687 = vst.msk [vmem:[%s1098_s7 + $0x68] sm:$0xff] %vm255_vm0, %v661_v45 }
 0x1db   : > { %686 = vst.msk [vmem:[%s1098_s7 + $0x60] sm:$0xff] %vm255_vm0, %v656_v47  ;;  %v906_v48 = vpop.f32.mrb[12].mxu1 }
 0x1dc   : > { %v671_v49 = vadd.f32 %v906_v48, %v772_v19  ;;  %v665_v50 = vpop.f32.mrb[13].mxu1 }
 0x1dd   : > { %v666_v51 = vadd.f32 %v772_v19, %v665_v50 }
 0x1de   : > { %689 = vst.msk [vmem:[%s1098_s7 + $0x78] sm:$0xff] %vm255_vm0, %v671_v49 }
 0x1df   : > { %688 = vst.msk [vmem:[%s1098_s7 + $0x70] sm:$0xff] %vm255_vm0, %v666_v51 }
 0x1e0 PF: > { %s15_s18 = sadd.s32 1, %s953_s18  }
 0x1e1   : > { %p12_p4 = scmp.ge.s32.totalorder %s15_s18, 4  }
 0x1e3   :  { %14 = sbr.rel (!%p12_p4) target bundleno = 1 (0x1), region = 70 }

</bundles_post_ra>
